<compile_context>
chip_gen: v6e
topology: v6e:2x2x1
jax: 0.10.0
libtpu: 0.0.40
codegen_flags: <defaults>
</compile_context>

<pallas_src>
import jax
import jax.numpy as jnp
from jax import lax
from jax.experimental import pallas as pl
from jax.experimental.pallas import tpu as pltpu

LANE = 128                 # TPU lane width
SUBLANE = 8                # f32 sublanes per vreg
TILE_QUANTUM = LANE * SUBLANE   # 1024 batch elements == one full (8,128) vreg plane
TB_MAX = 128 * 1024        # max batch elements per grid step
                           # VMEM: (8B in + 4B out) * TB * 2 buffers ~= 3 MiB

D_IN, D_H1, D_H2, D_OUT = 2, 6, 4, 1


def _round_up(a, m):
    return (a + m - 1) // m * m


def ffn_kernel(w1_ref, b1_ref, w2_ref, b2_ref, w3_ref, b3_ref, x_ref, o_ref):
    """Fused FFN over one (D_IN, r_tile, 128) batch tile (batch on sublanes+lanes).

    w*/b* refs are flattened f32 arrays resident in SMEM (row-major:
    w[k, j] -> w_ref[k * out + j]).  All math is VPU broadcast-FMA on dense
    (chunk, 128) slabs.
    """
    r_tile = x_ref.shape[1]                       # rows of 128 lanes in this tile
    chunk = 16 if r_tile % 16 == 0 else 8         # 1-2 vregs per intermediate
    n_chunks = r_tile // chunk

    # Hoist all 33 SMEM scalar reads out of the per-chunk loop (the scalar ->
    # vector splats happen per-use; keeping them as scalars bounds vreg
    # pressure inside the loop).
    w1 = [[w1_ref[k * D_H1 + j] for j in range(D_H1)] for k in range(D_IN)]
    b1 = [b1_ref[j] for j in range(D_H1)]
    w2 = [[w2_ref[k * D_H2 + j] for j in range(D_H2)] for k in range(D_H1)]
    b2 = [b2_ref[j] for j in range(D_H2)]
    w3 = [w3_ref[k] for k in range(D_H2)]
    b3 = b3_ref[0]

    def body(c, carry):
        r0 = pl.multiple_of(c * chunk, chunk)

        x0 = x_ref[0, pl.ds(r0, chunk), :]        # (chunk, 128) f32
        x1 = x_ref[1, pl.ds(r0, chunk), :]

        # Linear(2 -> 6) + ReLU
        h1 = [jnp.maximum(x0 * w1[0][j] + x1 * w1[1][j] + b1[j], 0.0)
              for j in range(D_H1)]

        # Linear(6 -> 4) + ReLU
        h2 = []
        for j in range(D_H2):
            acc = h1[0] * w2[0][j]
            for k in range(1, D_H1):
                acc = acc + h1[k] * w2[k][j]
            h2.append(jnp.maximum(acc + b2[j], 0.0))

        # Linear(4 -> 1)
        y = h2[0] * w3[0]
        for k in range(1, D_H2):
            y = y + h2[k] * w3[k]
        y = y + b3

        o_ref[0, pl.ds(r0, chunk), :] = y.astype(o_ref.dtype)
        return carry

    lax.fori_loop(0, n_chunks, body, 0, unroll=min(8, n_chunks))


@jax.jit
def ffn_forward(x, w1, b1, w2, b2, w3, b3):
    """x: (B, 2) float32 -> (B, 1) float32."""
    B = x.shape[0]

    # Pad batch to a whole number of (8,128) vreg planes, then pick the batch
    # tile so that (a) it is a multiple of TILE_QUANTUM (keeps every block
    # (8,128)-aligned), (b) it amortizes per-grid-step overhead, and (c) there
    # are >=2 grid steps whenever possible so v7x megacore can split the grid.
    b_min = _round_up(max(B, 1), TILE_QUANTUM)
    n_tiles = max(1, pl.cdiv(b_min, TB_MAX))
    if n_tiles == 1 and b_min >= 2 * TILE_QUANTUM:
        n_tiles = 2
    tb = _round_up(pl.cdiv(b_min, n_tiles), TILE_QUANTUM)
    b_pad = tb * n_tiles
    r_tile = tb // LANE

    # TODO(synk): accept a feature-planar (2, B) input upstream (or fuse into
    # the producer) to avoid this HBM pad+transpose relayout; with the (B, 2)
    # interface of the original module it is unavoidable.  The reshape to
    # (D_IN, b_pad//128, 128) is free (row-major split of the last dim).
    x_planes = (
        jnp.pad(x, ((0, b_pad - B), (0, 0)))      # (b_pad, 2)
        .T                                        # (2, b_pad)
        .reshape(D_IN, b_pad // LANE, LANE)       # (2, R, 128)
    )

    smem = pl.BlockSpec(memory_space=pltpu.MemorySpace.SMEM)

    out = pl.pallas_call(
        ffn_kernel,
        out_shape=jax.ShapeDtypeStruct((D_OUT, b_pad // LANE, LANE), x.dtype),
        grid=(n_tiles,),
        in_specs=[
            smem, smem,                                          # w1, b1
            smem, smem,                                          # w2, b2
            smem, smem,                                          # w3, b3
            pl.BlockSpec((D_IN, r_tile, LANE), lambda i: (0, i, 0)),   # x tile
        ],
        out_specs=pl.BlockSpec((D_OUT, r_tile, LANE), lambda i: (0, i, 0)),
        compiler_params=pltpu.CompilerParams(
            dimension_semantics=("parallel",)),
    )(
        w1.reshape(-1), b1.reshape(-1),
        w2.reshape(-1), b2.reshape(-1),
        w3.reshape(-1), b3.reshape(-1),
        x_planes,
    )

    # (1, R, 128) -> (1, b_pad) -> slice -> (B, 1); all layout-free.
    return out.reshape(D_OUT, b_pad)[:, :B].T


def init_params(key):
    # Deterministic, PyTorch-Linear-style uniform init: U(-1/sqrt(fan_in), ...).
    dims = [(D_IN, D_H1), (D_H1, D_H2), (D_H2, D_OUT)]
    params = []
    for i, (fan_in, fan_out) in enumerate(dims):
        kw, kb = jax.random.split(jax.random.fold_in(key, i))
        bound = 1.0 / (fan_in ** 0.5)
        w = jax.random.uniform(kw, (fan_in, fan_out), jnp.float32, -bound, bound)
        b = jax.random.uniform(kb, (fan_out,), jnp.float32, -bound, bound)
        params += [w, b]
    return params


def _reference(x, w1, b1, w2, b2, w3, b3):
    h = jnp.maximum(x @ w1 + b1, 0.0)
    h = jnp.maximum(h @ w2 + b2, 0.0)
    return h @ w3 + b3


if __name__ == "__main__":
    key = jax.random.PRNGKey(0)
    kx, kx2, kp = jax.random.split(key, 3)

    w1, b1, w2, b2, w3, b3 = init_params(kp)

    # Small batch (single grid step, single chunk).
    batch = 8
    x = jax.random.normal(kx, (batch, D_IN), dtype=jnp.float32)
    out = jax.block_until_ready(ffn_forward(x, w1, b1, w2, b2, w3, b3))
    ref = _reference(x, w1, b1, w2, b2, w3, b3)
    assert out.shape == (batch, D_OUT)
    assert jnp.allclose(out, ref, atol=1e-5, rtol=1e-5)

    # Larger batch exercising the multi-tile ("parallel") grid + padded tail.
    batch2 = 2500
    x2 = jax.random.normal(kx2, (batch2, D_IN), dtype=jnp.float32)
    out2 = jax.block_until_ready(ffn_forward(x2, w1, b1, w2, b2, w3, b3))
    ref2 = _reference(x2, w1, b1, w2, b2, w3, b3)
    assert out2.shape == (batch2, D_OUT)
    assert jnp.allclose(out2, ref2, atol=1e-5, rtol=1e-5)

    print("KERNEL_OK")
</pallas_src>

<mosaic_0001>
module attributes {stable_mosaic.version = 11 : i64} {
  func.func @ffn_kernel(%arg0: i32, %arg1: memref<12xf32, #tpu.memory_space<smem>>, %arg2: memref<6xf32, #tpu.memory_space<smem>>, %arg3: memref<24xf32, #tpu.memory_space<smem>>, %arg4: memref<4xf32, #tpu.memory_space<smem>>, %arg5: memref<4xf32, #tpu.memory_space<smem>>, %arg6: memref<1xf32, #tpu.memory_space<smem>>, %arg7: memref<2x8x128xf32, #tpu.memory_space<vmem>>, %arg8: memref<1x8x128xf32, #tpu.memory_space<vmem>>) attributes {dimension_semantics = [#tpu.dimension_semantics<parallel>], iteration_bounds = array<i64: 1>, scalar_prefetch = 0 : i64, scratch_operands = 0 : i64, tpu.core_type = #tpu.core_type<tc>, window_params = [{transform_indices = @transform_0, window_bounds = array<i64: 12>}, {transform_indices = @transform_1, window_bounds = array<i64: 6>}, {transform_indices = @transform_2, window_bounds = array<i64: 24>}, {transform_indices = @transform_3, window_bounds = array<i64: 4>}, {transform_indices = @transform_4, window_bounds = array<i64: 4>}, {transform_indices = @transform_5, window_bounds = array<i64: 1>}, {transform_indices = @transform_6, window_bounds = array<i64: 2, 8, 128>}, {transform_indices = @transform_7, window_bounds = array<i64: 1, 8, 128>}]} {
    %c0 = arith.constant 0 : index
    %0 = memref.load %arg1[%c0] : memref<12xf32, #tpu.memory_space<smem>>
    %c1 = arith.constant 1 : index
    %1 = memref.load %arg1[%c1] : memref<12xf32, #tpu.memory_space<smem>>
    %c2 = arith.constant 2 : index
    %2 = memref.load %arg1[%c2] : memref<12xf32, #tpu.memory_space<smem>>
    %c3 = arith.constant 3 : index
    %3 = memref.load %arg1[%c3] : memref<12xf32, #tpu.memory_space<smem>>
    %c4 = arith.constant 4 : index
    %4 = memref.load %arg1[%c4] : memref<12xf32, #tpu.memory_space<smem>>
    %c5 = arith.constant 5 : index
    %5 = memref.load %arg1[%c5] : memref<12xf32, #tpu.memory_space<smem>>
    %c6 = arith.constant 6 : index
    %6 = memref.load %arg1[%c6] : memref<12xf32, #tpu.memory_space<smem>>
    %c7 = arith.constant 7 : index
    %7 = memref.load %arg1[%c7] : memref<12xf32, #tpu.memory_space<smem>>
    %c8 = arith.constant 8 : index
    %8 = memref.load %arg1[%c8] : memref<12xf32, #tpu.memory_space<smem>>
    %c9 = arith.constant 9 : index
    %9 = memref.load %arg1[%c9] : memref<12xf32, #tpu.memory_space<smem>>
    %c10 = arith.constant 10 : index
    %10 = memref.load %arg1[%c10] : memref<12xf32, #tpu.memory_space<smem>>
    %c11 = arith.constant 11 : index
    %11 = memref.load %arg1[%c11] : memref<12xf32, #tpu.memory_space<smem>>
    %c0_0 = arith.constant 0 : index
    %12 = memref.load %arg2[%c0_0] : memref<6xf32, #tpu.memory_space<smem>>
    %c1_1 = arith.constant 1 : index
    %13 = memref.load %arg2[%c1_1] : memref<6xf32, #tpu.memory_space<smem>>
    %c2_2 = arith.constant 2 : index
    %14 = memref.load %arg2[%c2_2] : memref<6xf32, #tpu.memory_space<smem>>
    %c3_3 = arith.constant 3 : index
    %15 = memref.load %arg2[%c3_3] : memref<6xf32, #tpu.memory_space<smem>>
    %c4_4 = arith.constant 4 : index
    %16 = memref.load %arg2[%c4_4] : memref<6xf32, #tpu.memory_space<smem>>
    %c5_5 = arith.constant 5 : index
    %17 = memref.load %arg2[%c5_5] : memref<6xf32, #tpu.memory_space<smem>>
    %c0_6 = arith.constant 0 : index
    %18 = memref.load %arg3[%c0_6] : memref<24xf32, #tpu.memory_space<smem>>
    %c1_7 = arith.constant 1 : index
    %19 = memref.load %arg3[%c1_7] : memref<24xf32, #tpu.memory_space<smem>>
    %c2_8 = arith.constant 2 : index
    %20 = memref.load %arg3[%c2_8] : memref<24xf32, #tpu.memory_space<smem>>
    %c3_9 = arith.constant 3 : index
    %21 = memref.load %arg3[%c3_9] : memref<24xf32, #tpu.memory_space<smem>>
    %c4_10 = arith.constant 4 : index
    %22 = memref.load %arg3[%c4_10] : memref<24xf32, #tpu.memory_space<smem>>
    %c5_11 = arith.constant 5 : index
    %23 = memref.load %arg3[%c5_11] : memref<24xf32, #tpu.memory_space<smem>>
    %c6_12 = arith.constant 6 : index
    %24 = memref.load %arg3[%c6_12] : memref<24xf32, #tpu.memory_space<smem>>
    %c7_13 = arith.constant 7 : index
    %25 = memref.load %arg3[%c7_13] : memref<24xf32, #tpu.memory_space<smem>>
    %c8_14 = arith.constant 8 : index
    %26 = memref.load %arg3[%c8_14] : memref<24xf32, #tpu.memory_space<smem>>
    %c9_15 = arith.constant 9 : index
    %27 = memref.load %arg3[%c9_15] : memref<24xf32, #tpu.memory_space<smem>>
    %c10_16 = arith.constant 10 : index
    %28 = memref.load %arg3[%c10_16] : memref<24xf32, #tpu.memory_space<smem>>
    %c11_17 = arith.constant 11 : index
    %29 = memref.load %arg3[%c11_17] : memref<24xf32, #tpu.memory_space<smem>>
    %c12 = arith.constant 12 : index
    %30 = memref.load %arg3[%c12] : memref<24xf32, #tpu.memory_space<smem>>
    %c13 = arith.constant 13 : index
    %31 = memref.load %arg3[%c13] : memref<24xf32, #tpu.memory_space<smem>>
    %c14 = arith.constant 14 : index
    %32 = memref.load %arg3[%c14] : memref<24xf32, #tpu.memory_space<smem>>
    %c15 = arith.constant 15 : index
    %33 = memref.load %arg3[%c15] : memref<24xf32, #tpu.memory_space<smem>>
    %c16 = arith.constant 16 : index
    %34 = memref.load %arg3[%c16] : memref<24xf32, #tpu.memory_space<smem>>
    %c17 = arith.constant 17 : index
    %35 = memref.load %arg3[%c17] : memref<24xf32, #tpu.memory_space<smem>>
    %c18 = arith.constant 18 : index
    %36 = memref.load %arg3[%c18] : memref<24xf32, #tpu.memory_space<smem>>
    %c19 = arith.constant 19 : index
    %37 = memref.load %arg3[%c19] : memref<24xf32, #tpu.memory_space<smem>>
    %c20 = arith.constant 20 : index
    %38 = memref.load %arg3[%c20] : memref<24xf32, #tpu.memory_space<smem>>
    %c21 = arith.constant 21 : index
    %39 = memref.load %arg3[%c21] : memref<24xf32, #tpu.memory_space<smem>>
    %c22 = arith.constant 22 : index
    %40 = memref.load %arg3[%c22] : memref<24xf32, #tpu.memory_space<smem>>
    %c23 = arith.constant 23 : index
    %41 = memref.load %arg3[%c23] : memref<24xf32, #tpu.memory_space<smem>>
    %c0_18 = arith.constant 0 : index
    %42 = memref.load %arg4[%c0_18] : memref<4xf32, #tpu.memory_space<smem>>
    %c1_19 = arith.constant 1 : index
    %43 = memref.load %arg4[%c1_19] : memref<4xf32, #tpu.memory_space<smem>>
    %c2_20 = arith.constant 2 : index
    %44 = memref.load %arg4[%c2_20] : memref<4xf32, #tpu.memory_space<smem>>
    %c3_21 = arith.constant 3 : index
    %45 = memref.load %arg4[%c3_21] : memref<4xf32, #tpu.memory_space<smem>>
    %c0_22 = arith.constant 0 : index
    %46 = memref.load %arg5[%c0_22] : memref<4xf32, #tpu.memory_space<smem>>
    %c1_23 = arith.constant 1 : index
    %47 = memref.load %arg5[%c1_23] : memref<4xf32, #tpu.memory_space<smem>>
    %c2_24 = arith.constant 2 : index
    %48 = memref.load %arg5[%c2_24] : memref<4xf32, #tpu.memory_space<smem>>
    %c3_25 = arith.constant 3 : index
    %49 = memref.load %arg5[%c3_25] : memref<4xf32, #tpu.memory_space<smem>>
    %c0_26 = arith.constant 0 : index
    %50 = memref.load %arg6[%c0_26] : memref<1xf32, #tpu.memory_space<smem>>
    %c0_i32 = arith.constant 0 : i32
    %c8_i32 = arith.constant 8 : i32
    %51 = arith.muli %c0_i32, %c8_i32 : i32
    %52 = tpu.assume_multiple %51, 8 : i32
    %c0_27 = arith.constant 0 : index
    %53 = arith.index_cast %52 : i32 to index
    %c0_28 = arith.constant 0 : index
    %54 = vector.load %arg7[%c0_27, %53, %c0_28] : memref<2x8x128xf32, #tpu.memory_space<vmem>>, vector<1x8x128xf32>
    %55 = vector.shape_cast %54 : vector<1x8x128xf32> to vector<8x128xf32>
    %c1_29 = arith.constant 1 : index
    %56 = arith.index_cast %52 : i32 to index
    %c0_30 = arith.constant 0 : index
    %57 = vector.load %arg7[%c1_29, %56, %c0_30] : memref<2x8x128xf32, #tpu.memory_space<vmem>>, vector<1x8x128xf32>
    %58 = vector.shape_cast %57 : vector<1x8x128xf32> to vector<8x128xf32>
    %59 = vector.broadcast %0 : f32 to vector<8x128xf32>
    %60 = arith.mulf %55, %59 : vector<8x128xf32>
    %61 = vector.broadcast %6 : f32 to vector<8x128xf32>
    %62 = arith.mulf %58, %61 : vector<8x128xf32>
    %63 = arith.addf %60, %62 : vector<8x128xf32>
    %64 = vector.broadcast %12 : f32 to vector<8x128xf32>
    %65 = arith.addf %63, %64 : vector<8x128xf32>
    %cst = arith.constant 0.000000e+00 : f32
    %66 = vector.broadcast %cst : f32 to vector<8x128xf32>
    %67 = arith.maximumf %65, %66 : vector<8x128xf32>
    %68 = vector.broadcast %1 : f32 to vector<8x128xf32>
    %69 = arith.mulf %55, %68 : vector<8x128xf32>
    %70 = vector.broadcast %7 : f32 to vector<8x128xf32>
    %71 = arith.mulf %58, %70 : vector<8x128xf32>
    %72 = arith.addf %69, %71 : vector<8x128xf32>
    %73 = vector.broadcast %13 : f32 to vector<8x128xf32>
    %74 = arith.addf %72, %73 : vector<8x128xf32>
    %cst_31 = arith.constant 0.000000e+00 : f32
    %75 = vector.broadcast %cst_31 : f32 to vector<8x128xf32>
    %76 = arith.maximumf %74, %75 : vector<8x128xf32>
    %77 = vector.broadcast %2 : f32 to vector<8x128xf32>
    %78 = arith.mulf %55, %77 : vector<8x128xf32>
    %79 = vector.broadcast %8 : f32 to vector<8x128xf32>
    %80 = arith.mulf %58, %79 : vector<8x128xf32>
    %81 = arith.addf %78, %80 : vector<8x128xf32>
    %82 = vector.broadcast %14 : f32 to vector<8x128xf32>
    %83 = arith.addf %81, %82 : vector<8x128xf32>
    %cst_32 = arith.constant 0.000000e+00 : f32
    %84 = vector.broadcast %cst_32 : f32 to vector<8x128xf32>
    %85 = arith.maximumf %83, %84 : vector<8x128xf32>
    %86 = vector.broadcast %3 : f32 to vector<8x128xf32>
    %87 = arith.mulf %55, %86 : vector<8x128xf32>
    %88 = vector.broadcast %9 : f32 to vector<8x128xf32>
    %89 = arith.mulf %58, %88 : vector<8x128xf32>
    %90 = arith.addf %87, %89 : vector<8x128xf32>
    %91 = vector.broadcast %15 : f32 to vector<8x128xf32>
    %92 = arith.addf %90, %91 : vector<8x128xf32>
    %cst_33 = arith.constant 0.000000e+00 : f32
    %93 = vector.broadcast %cst_33 : f32 to vector<8x128xf32>
    %94 = arith.maximumf %92, %93 : vector<8x128xf32>
    %95 = vector.broadcast %4 : f32 to vector<8x128xf32>
    %96 = arith.mulf %55, %95 : vector<8x128xf32>
    %97 = vector.broadcast %10 : f32 to vector<8x128xf32>
    %98 = arith.mulf %58, %97 : vector<8x128xf32>
    %99 = arith.addf %96, %98 : vector<8x128xf32>
    %100 = vector.broadcast %16 : f32 to vector<8x128xf32>
    %101 = arith.addf %99, %100 : vector<8x128xf32>
    %cst_34 = arith.constant 0.000000e+00 : f32
    %102 = vector.broadcast %cst_34 : f32 to vector<8x128xf32>
    %103 = arith.maximumf %101, %102 : vector<8x128xf32>
    %104 = vector.broadcast %5 : f32 to vector<8x128xf32>
    %105 = arith.mulf %55, %104 : vector<8x128xf32>
    %106 = vector.broadcast %11 : f32 to vector<8x128xf32>
    %107 = arith.mulf %58, %106 : vector<8x128xf32>
    %108 = arith.addf %105, %107 : vector<8x128xf32>
    %109 = vector.broadcast %17 : f32 to vector<8x128xf32>
    %110 = arith.addf %108, %109 : vector<8x128xf32>
    %cst_35 = arith.constant 0.000000e+00 : f32
    %111 = vector.broadcast %cst_35 : f32 to vector<8x128xf32>
    %112 = arith.maximumf %110, %111 : vector<8x128xf32>
    %113 = vector.broadcast %18 : f32 to vector<8x128xf32>
    %114 = arith.mulf %67, %113 : vector<8x128xf32>
    %115 = vector.broadcast %22 : f32 to vector<8x128xf32>
    %116 = arith.mulf %76, %115 : vector<8x128xf32>
    %117 = arith.addf %114, %116 : vector<8x128xf32>
    %118 = vector.broadcast %26 : f32 to vector<8x128xf32>
    %119 = arith.mulf %85, %118 : vector<8x128xf32>
    %120 = arith.addf %117, %119 : vector<8x128xf32>
    %121 = vector.broadcast %30 : f32 to vector<8x128xf32>
    %122 = arith.mulf %94, %121 : vector<8x128xf32>
    %123 = arith.addf %120, %122 : vector<8x128xf32>
    %124 = vector.broadcast %34 : f32 to vector<8x128xf32>
    %125 = arith.mulf %103, %124 : vector<8x128xf32>
    %126 = arith.addf %123, %125 : vector<8x128xf32>
    %127 = vector.broadcast %38 : f32 to vector<8x128xf32>
    %128 = arith.mulf %112, %127 : vector<8x128xf32>
    %129 = arith.addf %126, %128 : vector<8x128xf32>
    %130 = vector.broadcast %42 : f32 to vector<8x128xf32>
    %131 = arith.addf %129, %130 : vector<8x128xf32>
    %cst_36 = arith.constant 0.000000e+00 : f32
    %132 = vector.broadcast %cst_36 : f32 to vector<8x128xf32>
    %133 = arith.maximumf %131, %132 : vector<8x128xf32>
    %134 = vector.broadcast %19 : f32 to vector<8x128xf32>
    %135 = arith.mulf %67, %134 : vector<8x128xf32>
    %136 = vector.broadcast %23 : f32 to vector<8x128xf32>
    %137 = arith.mulf %76, %136 : vector<8x128xf32>
    %138 = arith.addf %135, %137 : vector<8x128xf32>
    %139 = vector.broadcast %27 : f32 to vector<8x128xf32>
    %140 = arith.mulf %85, %139 : vector<8x128xf32>
    %141 = arith.addf %138, %140 : vector<8x128xf32>
    %142 = vector.broadcast %31 : f32 to vector<8x128xf32>
    %143 = arith.mulf %94, %142 : vector<8x128xf32>
    %144 = arith.addf %141, %143 : vector<8x128xf32>
    %145 = vector.broadcast %35 : f32 to vector<8x128xf32>
    %146 = arith.mulf %103, %145 : vector<8x128xf32>
    %147 = arith.addf %144, %146 : vector<8x128xf32>
    %148 = vector.broadcast %39 : f32 to vector<8x128xf32>
    %149 = arith.mulf %112, %148 : vector<8x128xf32>
    %150 = arith.addf %147, %149 : vector<8x128xf32>
    %151 = vector.broadcast %43 : f32 to vector<8x128xf32>
    %152 = arith.addf %150, %151 : vector<8x128xf32>
    %cst_37 = arith.constant 0.000000e+00 : f32
    %153 = vector.broadcast %cst_37 : f32 to vector<8x128xf32>
    %154 = arith.maximumf %152, %153 : vector<8x128xf32>
    %155 = vector.broadcast %20 : f32 to vector<8x128xf32>
    %156 = arith.mulf %67, %155 : vector<8x128xf32>
    %157 = vector.broadcast %24 : f32 to vector<8x128xf32>
    %158 = arith.mulf %76, %157 : vector<8x128xf32>
    %159 = arith.addf %156, %158 : vector<8x128xf32>
    %160 = vector.broadcast %28 : f32 to vector<8x128xf32>
    %161 = arith.mulf %85, %160 : vector<8x128xf32>
    %162 = arith.addf %159, %161 : vector<8x128xf32>
    %163 = vector.broadcast %32 : f32 to vector<8x128xf32>
    %164 = arith.mulf %94, %163 : vector<8x128xf32>
    %165 = arith.addf %162, %164 : vector<8x128xf32>
    %166 = vector.broadcast %36 : f32 to vector<8x128xf32>
    %167 = arith.mulf %103, %166 : vector<8x128xf32>
    %168 = arith.addf %165, %167 : vector<8x128xf32>
    %169 = vector.broadcast %40 : f32 to vector<8x128xf32>
    %170 = arith.mulf %112, %169 : vector<8x128xf32>
    %171 = arith.addf %168, %170 : vector<8x128xf32>
    %172 = vector.broadcast %44 : f32 to vector<8x128xf32>
    %173 = arith.addf %171, %172 : vector<8x128xf32>
    %cst_38 = arith.constant 0.000000e+00 : f32
    %174 = vector.broadcast %cst_38 : f32 to vector<8x128xf32>
    %175 = arith.maximumf %173, %174 : vector<8x128xf32>
    %176 = vector.broadcast %21 : f32 to vector<8x128xf32>
    %177 = arith.mulf %67, %176 : vector<8x128xf32>
    %178 = vector.broadcast %25 : f32 to vector<8x128xf32>
    %179 = arith.mulf %76, %178 : vector<8x128xf32>
    %180 = arith.addf %177, %179 : vector<8x128xf32>
    %181 = vector.broadcast %29 : f32 to vector<8x128xf32>
    %182 = arith.mulf %85, %181 : vector<8x128xf32>
    %183 = arith.addf %180, %182 : vector<8x128xf32>
    %184 = vector.broadcast %33 : f32 to vector<8x128xf32>
    %185 = arith.mulf %94, %184 : vector<8x128xf32>
    %186 = arith.addf %183, %185 : vector<8x128xf32>
    %187 = vector.broadcast %37 : f32 to vector<8x128xf32>
    %188 = arith.mulf %103, %187 : vector<8x128xf32>
    %189 = arith.addf %186, %188 : vector<8x128xf32>
    %190 = vector.broadcast %41 : f32 to vector<8x128xf32>
    %191 = arith.mulf %112, %190 : vector<8x128xf32>
    %192 = arith.addf %189, %191 : vector<8x128xf32>
    %193 = vector.broadcast %45 : f32 to vector<8x128xf32>
    %194 = arith.addf %192, %193 : vector<8x128xf32>
    %cst_39 = arith.constant 0.000000e+00 : f32
    %195 = vector.broadcast %cst_39 : f32 to vector<8x128xf32>
    %196 = arith.maximumf %194, %195 : vector<8x128xf32>
    %197 = vector.broadcast %46 : f32 to vector<8x128xf32>
    %198 = arith.mulf %133, %197 : vector<8x128xf32>
    %199 = vector.broadcast %47 : f32 to vector<8x128xf32>
    %200 = arith.mulf %154, %199 : vector<8x128xf32>
    %201 = arith.addf %198, %200 : vector<8x128xf32>
    %202 = vector.broadcast %48 : f32 to vector<8x128xf32>
    %203 = arith.mulf %175, %202 : vector<8x128xf32>
    %204 = arith.addf %201, %203 : vector<8x128xf32>
    %205 = vector.broadcast %49 : f32 to vector<8x128xf32>
    %206 = arith.mulf %196, %205 : vector<8x128xf32>
    %207 = arith.addf %204, %206 : vector<8x128xf32>
    %208 = vector.broadcast %50 : f32 to vector<8x128xf32>
    %209 = arith.addf %207, %208 : vector<8x128xf32>
    %c0_40 = arith.constant 0 : index
    %210 = arith.index_cast %52 : i32 to index
    %c0_41 = arith.constant 0 : index
    %211 = vector.load %arg8[%c0_40, %210, %c0_41] : memref<1x8x128xf32, #tpu.memory_space<vmem>>, vector<1x8x128xf32>
    %212 = vector.shape_cast %211 : vector<1x8x128xf32> to vector<8x128xf32>
    %213 = vector.shape_cast %209 : vector<8x128xf32> to vector<1x8x128xf32>
    tpu.vector_store %arg8[%c0_40, %210, %c0_41], %213 {strides = array<i32>} : memref<1x8x128xf32, #tpu.memory_space<vmem>>, vector<1x8x128xf32>,
    %c1_i32 = arith.constant 1 : i32
    return
  }
  func.func @transform_0(%arg0: i32) -> i32 {
    %c0_i32 = arith.constant 0 : i32
    %c0_i32_0 = arith.constant 0 : i32
    return %c0_i32 : i32
  }
  func.func @transform_1(%arg0: i32) -> i32 {
    %c0_i32 = arith.constant 0 : i32
    %c0_i32_0 = arith.constant 0 : i32
    return %c0_i32 : i32
  }
  func.func @transform_2(%arg0: i32) -> i32 {
    %c0_i32 = arith.constant 0 : i32
    %c0_i32_0 = arith.constant 0 : i32
    return %c0_i32 : i32
  }
  func.func @transform_3(%arg0: i32) -> i32 {
    %c0_i32 = arith.constant 0 : i32
    %c0_i32_0 = arith.constant 0 : i32
    return %c0_i32 : i32
  }
  func.func @transform_4(%arg0: i32) -> i32 {
    %c0_i32 = arith.constant 0 : i32
    %c0_i32_0 = arith.constant 0 : i32
    return %c0_i32 : i32
  }
  func.func @transform_5(%arg0: i32) -> i32 {
    %c0_i32 = arith.constant 0 : i32
    %c0_i32_0 = arith.constant 0 : i32
    return %c0_i32 : i32
  }
  func.func @transform_6(%arg0: i32) -> (i32, i32, i32) {
    %c0_i32 = arith.constant 0 : i32
    %c0_i32_0 = arith.constant 0 : i32
    %c0_i32_1 = arith.constant 0 : i32
    return %c0_i32, %arg0, %c0_i32_0 : i32, i32, i32
  }
  func.func @transform_7(%arg0: i32) -> (i32, i32, i32) {
    %c0_i32 = arith.constant 0 : i32
    %c0_i32_0 = arith.constant 0 : i32
    %c0_i32_1 = arith.constant 0 : i32
    return %c0_i32, %arg0, %c0_i32_0 : i32, i32, i32
  }
}

</mosaic_0001>

<bundles_post_ra>
// kernel: ffn_forward.1
= control target key start
LH: loop header
LB: loop body
LE: loop exit
PB: predicated region body
PF: predicated region fallthrough
CT: control target
= control target key end

     0   :  { %13 = vsyncpa [#allocation4], 0  ;;  %s576_s0 = inlined_call_operand.vmem [shape: f32[12], index: 0, kind: input, shape index: {}]   ;;  %s577_s1 = inlined_call_operand.vmem [shape: f32[6], index: 1, kind: input, shape index: {}]   ;;  %s578_s2 = inlined_call_operand.vmem [shape: f32[24], index: 2, kind: input, shape index: {}]   ;;  %s579_s3 = inlined_call_operand.vmem [shape: f32[4], index: 3, kind: input, shape index: {}]   ;;  %s580_s4 = inlined_call_operand.vmem [shape: f32[4], index: 4, kind: input, shape index: {}]   ;;  %s581_s5 = inlined_call_operand.<no memory space> [shape: f32[1], index: 5, kind: input, shape index: {}]   ;;  %s582_s6 = inlined_call_operand.vmem [shape: f32[2,8,128], index: 6, kind: input, shape index: {}]   ;;  %s583_s7 = inlined_call_operand.vmem [shape: f32[1,8,128], index: 7, kind: output, shape index: {}]  }
   0x1   :  { %14 = vsyncpa [#allocation6], 0  ;;  %s32_s26 = sshll.u32 %s577_s1, 4  ;;  %s33_s26 = int_to_ptr.vmem [resolvable:$true] %s32_s26 }
   0x2   :  { %15 = vsyncpa [#allocation9], 0  ;;  %s52_s29 = sshll.u32 %s579_s3, 4  ;;  %s342_s30 = scalar_lea.vmem %s33_s26, 16  ;;  %s53_s29 = int_to_ptr.vmem [resolvable:$true] %s52_s29 }
   0x3   :  { %p343_p0 = scmp.ne.s32.totalorder %s33_s26, %s342_s30  ;;  %p347_p1 = scmp.lt.s32.totalorder %s33_s26, %s33_s26 }
   0x4   :  { %p348_p2 = scmp.lt.s32.totalorder %s342_s30, %s342_s30 }
   0x6   :  { %p349_p3 = por %p348_p2, %p347_p1 }
   0x8   :  { %p350_p4 = pnand %p349_p3, %p343_p0 }
   0xa   :  { %353 = shalt.err (!%p350_p4)
}
   0xb   :  { %s408_s8 = smov [#allocation5]   ;;  %s354_s9 = scalar_lea.vmem %s53_s29, 16 }
   0xc   :  { %35 = dma.vmem_to_smem %s33_s26, 16, %s408_s8, [#allocation6]  }
   0xd   :  { %p355_p5 = scmp.ne.s32.totalorder %s53_s29, %s354_s9  ;;  %p359_p6 = scmp.lt.s32.totalorder %s53_s29, %s53_s29 }
   0xe   :  { %p360_p7 = scmp.lt.s32.totalorder %s354_s9, %s354_s9 }
  0x10   :  { %p361_p8 = por %p360_p7, %p359_p6 }
  0x12   :  { %p362_p9 = pnand %p361_p8, %p355_p5 }
  0x14   :  { %365 = shalt.err (!%p362_p9)
}
  0x15   :  { %s409_s1 = smov [#allocation8]   ;;  %s22_s11 = sshll.u32 %s576_s0, 4  ;;  %s23_s11 = int_to_ptr.vmem [resolvable:$true] %s22_s11 }
  0x16   :  { %55 = dma.vmem_to_smem %s53_s29, 16, %s409_s1, [#allocation9]  }
  0x17   :  { %s42_s14 = sshll.u32 %s578_s2, 4  ;;  %s366_s15 = scalar_lea.vmem %s23_s11, 16  ;;  %s43_s14 = int_to_ptr.vmem [resolvable:$true] %s42_s14 }
  0x18   :  { %p367_p10 = scmp.ne.s32.totalorder %s23_s11, %s366_s15  ;;  %p371_p11 = scmp.lt.s32.totalorder %s23_s11, %s23_s11 }
  0x19   :  { %p372_p12 = scmp.lt.s32.totalorder %s366_s15, %s366_s15 }
  0x1b   :  { %p373_p13 = por %p372_p12, %p371_p11 }
  0x1d   :  { %p374_p0 = pnand %p373_p13, %p367_p10 }
  0x1f   :  { %377 = shalt.err (!%p374_p0)
}
  0x20   :  { %s410_s16 = smov [#allocation3]   ;;  %s378_s17 = scalar_lea.vmem %s43_s14, 16 }
  0x21   :  { %25 = dma.vmem_to_smem %s23_s11, 16, %s410_s16, [#allocation4]  }
  0x22   :  { %p379_p1 = scmp.ne.s32.totalorder %s43_s14, %s378_s17  ;;  %p383_p2 = scmp.lt.s32.totalorder %s43_s14, %s43_s14 }
  0x23   :  { %p384_p3 = scmp.lt.s32.totalorder %s378_s17, %s378_s17 }
  0x25   :  { %p385_p4 = por %p384_p3, %p383_p2 }
  0x27   :  { %p386_p5 = pnand %p385_p4, %p379_p1 }
  0x29   :  { %389 = shalt.err (!%p386_p5)
}
  0x2a   :  { %s411_s0 = smov [#allocation7]   ;;  %s62_s19 = sshll.u32 %s580_s4, 4  ;;  %s63_s19 = int_to_ptr.vmem [resolvable:$true] %s62_s19 }
  0x2b   :  { %45 = dma.vmem_to_smem %s43_s14, 16, %s411_s0, [#allocation6]  }
  0x2c   :  { %s390_s20 = scalar_lea.vmem %s63_s19, 16  ;;  %p395_p7 = scmp.lt.s32.totalorder %s63_s19, %s63_s19 }
  0x2d   :  { %p391_p6 = scmp.ne.s32.totalorder %s63_s19, %s390_s20  ;;  %p396_p8 = scmp.lt.s32.totalorder %s390_s20, %s390_s20 }
  0x2f   :  { %p397_p9 = por %p396_p8, %p395_p7 }
  0x31   :  { %p398_p10 = pnand %p397_p9, %p391_p6 }
  0x33   :  { %401 = shalt.err (!%p398_p10)
}
  0x34   :  { %s412_s21 = smov [#allocation10]  }
  0x35   :  { %65 = dma.vmem_to_smem %s63_s19, 16, %s412_s21, [#allocation9]  }
  0x36   :  { %402 = dma.done.wait [#allocation4], 16  }
  0x37   :  { %403 = vsyncadd [#allocation4], 4294967280 }
  0x38   :  { %404 = dma.done.wait [#allocation6], 32  }
  0x39   :  { %405 = vsyncadd [#allocation6], 4294967264 }
  0x3a   :  { %406 = dma.done.wait [#allocation9], 32  }
  0x3b   :  { %407 = vsyncadd [#allocation9], 4294967264 }
  0x3c   :  { %85 = sfence }
  0x3d   :  { %s86_s22 = sld [smem:[#allocation3]]  ;;  %v137_v0 = vld [vmem:[%s582_s6] sm:$0xff]  ;;  %v336_v2 = vld [vmem:[%s582_s6 + $0x8] sm:$0xff] }
  0x3e   :  { %s291_s23 = sld [smem:[#allocation3 + $0x1]] }
  0x3f   :  { %s292_s4 = sld [smem:[#allocation3 + $0x2]] }
  0x40   :  { %s468_s24 = sld [smem:[#allocation3 + $0x3]] }
  0x41   :  { %s470_s25 = sld [smem:[#allocation3 + $0x4]] }
  0x42   :  { %s472_s26 = sld [smem:[#allocation3 + $0x5]] }
  0x43   :  { %s296_s27 = sld [smem:[#allocation3 + $0x6]]  ;;  %v141_v1 = vstv %s86_s22 }
  0x44   :  { %s297_s28 = sld [smem:[#allocation3 + $0x7]]  ;;  %v149_v3 = vstv %s291_s23  ;;  %v142_v4 = vmul.f32 %v141_v1, %v137_v0 }
  0x45   :  { %s298_s29 = sld [smem:[#allocation3 + $0x8]]  ;;  %v150_v7 = vmul.f32 %v149_v3, %v137_v0  ;;  %v157_v9 = vstv %s292_s4 }
  0x46   :  { %s477_s9 = sld [smem:[#allocation3 + $0x9]]  ;;  %v158_v13 = vmul.f32 %v157_v9, %v137_v0  ;;  %v165_v16 = vstv %s468_s24 }
  0x47   :  { %s479_s1 = sld [smem:[#allocation3 + $0xa]]  ;;  %v173_v21 = vstv %s470_s25  ;;  %v166_v22 = vmul.f32 %v165_v16, %v137_v0 }
  0x48   :  { %s484_s11 = sld [smem:[#allocation3 + $0xb]]  ;;  %v174_v28 = vmul.f32 %v173_v21, %v137_v0  ;;  %v181_v31 = vstv %s472_s26 }
  0x49   :  { %s98_s12 = sld [smem:[#allocation5]]  ;;  %v143_v5 = vstv %s296_s27  ;;  %v182_v39 = vmul.f32 %v181_v31, %v137_v0 }
  0x4a   :  { %s302_s13 = sld [smem:[#allocation5 + $0x1]]  ;;  %v144_v6 = vmul.f32 %v336_v2, %v143_v5  ;;  %v151_v8 = vstv %s297_s28 }
  0x4b   :  { %s486_s14 = sld [smem:[#allocation5 + $0x2]]  ;;  %v152_v10 = vmul.f32 %v336_v2, %v151_v8  ;;  %v159_v11 = vstv %s298_s29 }
  0x4c   :  { %s488_s15 = sld [smem:[#allocation5 + $0x3]]  ;;  %v145_v12 = vadd.f32 %v144_v6, %v142_v4  ;;  %v160_v15 = vmul.f32 %v336_v2, %v159_v11  ;;  %v167_v17 = vstv %s477_s9 }
  0x4d   :  { %s490_s6 = sld [smem:[#allocation5 + $0x4]]  ;;  %v153_v14 = vadd.f32 %v152_v10, %v150_v7  ;;  %v168_v23 = vmul.f32 %v336_v2, %v167_v17  ;;  %v175_v24 = vstv %s479_s1 }
  0x4e   :  { %s492_s16 = sld [smem:[#allocation5 + $0x5]]  ;;  %v161_v26 = vadd.f32 %v160_v15, %v158_v13  ;;  %v176_v30 = vmul.f32 %v336_v2, %v175_v24  ;;  %v183_v32 = vstv %s484_s11 }
  0x4f   :  { %s496_s17 = sld [smem:[#allocation7]]  ;;  %v146_v18 = vstv %s98_s12  ;;  %v169_v33 = vadd.f32 %v168_v23, %v166_v22  ;;  %v184_v40 = vmul.f32 %v336_v2, %v183_v32 }
  0x50   :  { %s498_s0 = sld [smem:[#allocation7 + $0x1]]  ;;  %v147_v19 = vadd.f32 %v146_v18, %v145_v12  ;;  %v154_v20 = vstv %s302_s13  ;;  %v177_v42 = vadd.f32 %v176_v30, %v174_v28 }
  0x51   :  { %s501_s2 = sld [smem:[#allocation7 + $0x2]]  ;;  %v155_v25 = vadd.f32 %v154_v20, %v153_v14  ;;  %v162_v27 = vstv %s486_s14  ;;  %v185_v53 = vadd.f32 %v184_v40, %v182_v39 }
  0x52   :  { %s504_s18 = sld [smem:[#allocation7 + $0x3]]  ;;  %v148_v29 = vmax.f32 %v147_v19, 0.0  ;;  %v163_v36 = vadd.f32 %v162_v27, %v161_v26  ;;  %v170_v37 = vstv %s488_s15 }
  0x53   :  { %s506_s19 = sld [smem:[#allocation7 + $0x4]]  ;;  %v156_v35 = vmax.f32 %v155_v25, 0.0  ;;  %v171_v45 = vadd.f32 %v170_v37, %v169_v33  ;;  %v178_v46 = vstv %s490_s6 }
  0x54   :  { %s509_s20 = sld [smem:[#allocation7 + $0x5]]  ;;  %v164_v49 = vmax.f32 %v163_v36, 0.0  ;;  %v179_v57 = vadd.f32 %v178_v46, %v177_v42  ;;  %v186_v61 = vstv %s492_s16 }
  0x55   :  { %s513_s21 = sld [smem:[#allocation7 + $0x6]]  ;;  %v189_v34 = vstv %s496_s17  ;;  %v172_v1 = vmax.f32 %v171_v45, 0.0  ;;  %v187_v11 = vadd.f32 %v186_v61, %v185_v53 }
  0x56   :  { %s516_s22 = sld [smem:[#allocation7 + $0x7]]  ;;  %v209_v38 = vstv %s498_s0  ;;  %v190_v43 = vmul.f32 %v189_v34, %v148_v29  ;;  %v180_v15 = vmax.f32 %v179_v57, 0.0 }
  0x57   :  { %s520_s23 = sld [smem:[#allocation7 + $0x8]]  ;;  %v229_v41 = vstv %s501_s2  ;;  %v210_v48 = vmul.f32 %v209_v38, %v148_v29  ;;  %v188_v28 = vmax.f32 %v187_v11, 0.0 }
  0x58   :  { %s523_s4 = sld [smem:[#allocation7 + $0x9]]  ;;  %v249_v44 = vstv %s504_s18  ;;  %v230_v52 = vmul.f32 %v229_v41, %v148_v29 }
  0x59   :  { %s526_s24 = sld [smem:[#allocation7 + $0xa]]  ;;  %v191_v47 = vstv %s506_s19  ;;  %v250_v56 = vmul.f32 %v249_v44, %v148_v29 }
  0x5a   :  { %s530_s25 = sld [smem:[#allocation7 + $0xb]]  ;;  %v192_v50 = vmul.f32 %v191_v47, %v156_v35  ;;  %v211_v51 = vstv %s509_s20 }
  0x5b   :  { %s533_s26 = sld [smem:[#allocation7 + $0xc]]  ;;  %v212_v54 = vmul.f32 %v211_v51, %v156_v35  ;;  %v231_v55 = vstv %s513_s21 }
  0x5c   :  { %s536_s27 = sld [smem:[#allocation7 + $0xd]]  ;;  %v193_v58 = vadd.f32 %v192_v50, %v190_v43  ;;  %v232_v59 = vmul.f32 %v231_v55, %v156_v35  ;;  %v251_v60 = vstv %s516_s22 }
  0x5d   :  { %s539_s28 = sld [smem:[#allocation7 + $0xe]]  ;;  %v194_v62 = vstv %s520_s23  ;;  %v213_v63 = vadd.f32 %v212_v54, %v210_v48  ;;  %v252_v0 = vmul.f32 %v251_v60, %v156_v35 }
  0x5e   :  { %s543_s29 = sld [smem:[#allocation7 + $0xf]]  ;;  %v195_v2 = vmul.f32 %v194_v62, %v164_v49  ;;  %v214_v3 = vstv %s523_s4  ;;  %v233_v4 = vadd.f32 %v232_v59, %v230_v52 }
  0x5f   :  { %s546_s30 = sld [smem:[#allocation7 + $0x10]]  ;;  %v215_v5 = vmul.f32 %v214_v3, %v164_v49  ;;  %v234_v6 = vstv %s526_s24  ;;  %v253_v7 = vadd.f32 %v252_v0, %v250_v56 }
  0x60   :  { %s549_s8 = sld [smem:[#allocation7 + $0x11]]  ;;  %v196_v8 = vadd.f32 %v195_v2, %v193_v58  ;;  %v235_v9 = vmul.f32 %v234_v6, %v164_v49  ;;  %v254_v10 = vstv %s530_s25 }
  0x61   :  { %s552_s9 = sld [smem:[#allocation7 + $0x12]]  ;;  %v197_v12 = vstv %s533_s26  ;;  %v216_v13 = vadd.f32 %v215_v5, %v213_v63  ;;  %v255_v14 = vmul.f32 %v254_v10, %v164_v49 }
  0x62   :  { %s555_s1 = sld [smem:[#allocation7 + $0x13]]  ;;  %v198_v16 = vmul.f32 %v197_v12, %v172_v1  ;;  %v217_v17 = vstv %s536_s27  ;;  %v236_v18 = vadd.f32 %v235_v9, %v233_v4  ;;  %v280_v12 = vstv %s581_s5 }
  0x63   :  { %s326_s3 = sld [smem:[#allocation7 + $0x14]]  ;;  %v218_v19 = vmul.f32 %v217_v17, %v172_v1  ;;  %v237_v20 = vstv %s539_s28  ;;  %v256_v21 = vadd.f32 %v255_v14, %v253_v7 }
  0x64   :  { %s327_s10 = sld [smem:[#allocation7 + $0x15]]  ;;  %v199_v22 = vadd.f32 %v198_v16, %v196_v8  ;;  %v238_v23 = vmul.f32 %v237_v20, %v172_v1  ;;  %v257_v24 = vstv %s543_s29 }
  0x65   :  { %s560_s11 = sld [smem:[#allocation7 + $0x16]]  ;;  %v200_v25 = vstv %s546_s30  ;;  %v219_v26 = vadd.f32 %v218_v19, %v216_v13  ;;  %v258_v27 = vmul.f32 %v257_v24, %v172_v1 }
  0x66   :  { %s563_s12 = sld [smem:[#allocation7 + $0x17]]  ;;  %v201_v29 = vmul.f32 %v200_v25, %v180_v15  ;;  %v220_v30 = vstv %s549_s8  ;;  %v239_v31 = vadd.f32 %v238_v23, %v236_v18 }
  0x67   :  { %s128_s13 = sld [smem:[#allocation8]]  ;;  %v221_v32 = vmul.f32 %v220_v30, %v180_v15  ;;  %v240_v33 = vstv %s552_s9  ;;  %v259_v34 = vadd.f32 %v258_v27, %v256_v21 }
  0x68   :  { %s330_s14 = sld [smem:[#allocation8 + $0x1]]  ;;  %v202_v35 = vadd.f32 %v201_v29, %v199_v22  ;;  %v241_v36 = vmul.f32 %v240_v33, %v180_v15  ;;  %v260_v37 = vstv %s555_s1 }
  0x69   :  { %s331_s15 = sld [smem:[#allocation8 + $0x2]]  ;;  %v203_v38 = vstv %s326_s3  ;;  %v222_v39 = vadd.f32 %v221_v32, %v219_v26  ;;  %v261_v40 = vmul.f32 %v260_v37, %v180_v15 }
  0x6a   :  { %s332_s6 = sld [smem:[#allocation8 + $0x3]]  ;;  %v204_v41 = vmul.f32 %v203_v38, %v188_v28  ;;  %v223_v42 = vstv %s327_s10  ;;  %v242_v43 = vadd.f32 %v241_v36, %v239_v31 }
  0x6b   :  { %s132_s16 = sld [smem:[#allocation10]]  ;;  %v224_v44 = vmul.f32 %v223_v42, %v188_v28  ;;  %v243_v45 = vstv %s560_s11  ;;  %v262_v46 = vadd.f32 %v261_v40, %v259_v34 }
  0x6c   :  { %s333_s17 = sld [smem:[#allocation10 + $0x1]]  ;;  %v205_v47 = vadd.f32 %v204_v41, %v202_v35  ;;  %v244_v48 = vmul.f32 %v243_v45, %v188_v28  ;;  %v263_v49 = vstv %s563_s12 }
  0x6d   :  { %s334_s0 = sld [smem:[#allocation10 + $0x2]]  ;;  %v206_v50 = vstv %s128_s13  ;;  %v225_v51 = vadd.f32 %v224_v44, %v222_v39  ;;  %v264_v52 = vmul.f32 %v263_v49, %v188_v28 }
  0x6e   :  { %s335_s2 = sld [smem:[#allocation10 + $0x3]]  ;;  %v207_v53 = vadd.f32 %v206_v50, %v205_v47  ;;  %v226_v54 = vstv %s330_s14  ;;  %v245_v55 = vadd.f32 %v244_v48, %v242_v43 }
  0x6f   :  { %v227_v56 = vadd.f32 %v226_v54, %v225_v51  ;;  %v246_v57 = vstv %s331_s15  ;;  %v265_v58 = vadd.f32 %v264_v52, %v262_v46 }
  0x70   :  { %v208_v59 = vmax.f32 %v207_v53, 0.0  ;;  %v247_v60 = vadd.f32 %v246_v57, %v245_v55  ;;  %v266_v61 = vstv %s332_s6 }
  0x71   :  { %v228_v62 = vmax.f32 %v227_v56, 0.0  ;;  %v267_v63 = vadd.f32 %v266_v61, %v265_v58  ;;  %v269_v0 = vstv %s132_s16 }
  0x72   :  { %v248_v1 = vmax.f32 %v247_v60, 0.0  ;;  %v270_v2 = vmul.f32 %v269_v0, %v208_v59  ;;  %v271_v3 = vstv %s333_s17 }
  0x73   :  { %v268_v4 = vmax.f32 %v267_v63, 0.0  ;;  %v272_v5 = vmul.f32 %v271_v3, %v228_v62  ;;  %v274_v6 = vstv %s334_s0 }
  0x74   :  { %v275_v7 = vmul.f32 %v274_v6, %v248_v1  ;;  %v277_v8 = vstv %s335_s2 }
  0x75   :  { %v273_v9 = vadd.f32 %v272_v5, %v270_v2  ;;  %v278_v10 = vmul.f32 %v277_v8, %v268_v4 }
  0x77   :  { %v276_v11 = vadd.f32 %v275_v7, %v273_v9 }
  0x79   :  { %v279_v13 = vadd.f32 %v278_v10, %v276_v11 }
  0x7b   :  { %v281_v14 = vadd.f32 %v280_v12, %v279_v13 }
  0x7d   :  { %282 = vst [vmem:[%s583_s7] sm:$0xff] %v281_v14 }
  0x7e   :  { %287 = vsyncpa [#allocation4], 1 }
  0x7f   :  { %288 = vsyncpa [#allocation6], 1 }
  0x80   :  { %289 = vsyncpa [#allocation9], 1 }

</bundles_post_ra>
